<compile_context>
chip_gen: v6e
topology: v6e:2x2x1
jax: 0.10.0
libtpu: 0.0.40
codegen_flags: <defaults>
</compile_context>

<pallas_src>
import functools

import jax
import jax.numpy as jnp
import numpy as np
from jax import lax
from jax.experimental import pallas as pl
from jax.experimental.pallas import tpu as pltpu


def _round_up(x, m):
    return (x + m - 1) // m * m


def _vmem_budget_bytes():
    """Per-kernel VMEM budget, derived from the chip's capacity when possible."""
    cap = None
    try:
        info = pltpu.get_tpu_info()
        cap = getattr(info, "vmem_capacity_bytes", None)
    except Exception:
        cap = None
    if not cap:
        cap = 64 * 1024 * 1024  # conservative default (v7x physical VMEM)
    # ~25% headroom for compiler scratch / semaphores / small operands;
    # never ask for more than 96 MiB even on 128 MiB parts (v5e/v6e).
    return int(min(cap * 3 // 4, 96 * 1024 * 1024))


# ---------------------------------------------------------------------------
# Fused single-pass kernel (whole image resident in VMEM).  grid = (N,).
# x is read from HBM once; out written once.
# ---------------------------------------------------------------------------
def _cbam_fused_kernel(x_ref, w1_ref, b1_ref, w2_ref, b2_ref, wsa_ref, bsa_ref,
                       out_ref, *, inv_hw):
    x = x_ref[0]                                                        # (C, HW)

    # ---- channel attention: ca_w = sigmoid(W2 @ relu(W1 @ mean(x) + b1) + b2)
    pooled = jnp.sum(x.astype(jnp.float32), axis=1, keepdims=True) * inv_hw   # (C,1)
    h = jnp.sum(pooled * w1_ref[...], axis=0, keepdims=True) + b1_ref[...]    # (1,hid)
    h = jnp.maximum(h, 0.0)
    logit = jnp.sum(w2_ref[...] * h, axis=1, keepdims=True) + b2_ref[...]     # (C,1)
    ca_w = jax.nn.sigmoid(logit)                                              # (C,1) f32

    # ---- apply: ca = ca_w * x ; sa = sigmoid(wsa . ca + bsa) ; out = ca * sa
    ca = ca_w.astype(x.dtype) * x                                             # (C,HW)
    sa_logit = jnp.dot(wsa_ref[...].astype(x.dtype), ca,
                       preferred_element_type=jnp.float32)                    # (1,HW)
    sa = jax.nn.sigmoid(sa_logit + bsa_ref[0, 0])                             # (1,HW) f32
    out_ref[0] = (ca * sa.astype(x.dtype)).astype(out_ref.dtype)


# ---------------------------------------------------------------------------
# Two-pass fallback, pass 1: pooled mean + bottleneck MLP -> ca_w (N, C, 1).
# Grid (N, HW_tiles); HW-tile axis is the (serial) reduction axis.
# ---------------------------------------------------------------------------
def _pool_mlp_kernel(x_ref, w1_ref, b1_ref, w2_ref, b2_ref, caw_ref, psum_ref,
                     *, hw, tile_hw, inv_hw):
    t = pl.program_id(1)

    @pl.when(t == 0)
    def _():
        psum_ref[...] = jnp.zeros_like(psum_ref)

    x = x_ref[0]                                                       # (C, tile_hw)
    if hw % tile_hw != 0:
        # Ragged final tile: zero the garbage tail lanes so the sum is exact.
        lane = lax.broadcasted_iota(jnp.int32, x.shape, 1)
        x = jnp.where(t * tile_hw + lane < hw, x, 0)

    # Lane-wise partial sums on the VALU; the single cross-lane (XLU) reduce
    # happens once, in the final-tile branch below.
    p = x[:, 0:128].astype(jnp.float32)
    for k in range(1, tile_hw // 128):
        p = p + x[:, k * 128:(k + 1) * 128].astype(jnp.float32)
    psum_ref[...] += p                                                 # (C, 128)

    @pl.when(t == pl.num_programs(1) - 1)
    def _():
        pooled = jnp.sum(psum_ref[...], axis=1, keepdims=True) * inv_hw       # (C,1)
        h = jnp.sum(pooled * w1_ref[...], axis=0, keepdims=True) + b1_ref[...]
        h = jnp.maximum(h, 0.0)                                               # (1,hid)
        logit = jnp.sum(w2_ref[...] * h, axis=1, keepdims=True) + b2_ref[...]
        caw_ref[0] = jax.nn.sigmoid(logit)                                    # (C,1)


# ---------------------------------------------------------------------------
# Two-pass fallback, pass 2: streaming apply (both grid axes parallel).
#   ca  = ca_w * x
#   sa  = sigmoid(wsa . ca + bsa)    (cross-channel reduce on the MXU)
#   out = ca * sa
# Out-of-range columns of a ragged final tile are discarded by Pallas.
# ---------------------------------------------------------------------------
def _apply_kernel(x_ref, caw_ref, wsa_ref, bsa_ref, out_ref):
    x = x_ref[0]                                                       # (C, T) native dtype
    ca_w = caw_ref[0]                                                  # (C, 1) f32
    ca = ca_w.astype(x.dtype) * x                                      # (C, T)
    sa_logit = jnp.dot(wsa_ref[...].astype(x.dtype), ca,
                       preferred_element_type=jnp.float32)             # (1, T)
    sa = jax.nn.sigmoid(sa_logit + bsa_ref[0, 0])                      # (1, T) f32
    out_ref[0] = (ca * sa.astype(x.dtype)).astype(out_ref.dtype)


def cbam_forward(x, params, *, force_two_pass=False):
    """CBAM forward (NCHW) via Pallas TPU kernels."""
    N, C, H, W = x.shape
    HW = H * W
    f32 = jnp.float32

    w1 = params["w1"].astype(f32)                    # (C, hidden)
    b1 = params["b1"].astype(f32)                    # (1, hidden)
    w2 = params["w2"].astype(f32)                    # (C, hidden)
    b2 = params["b2"].astype(f32)                    # (C, 1)
    wsa_row = params["wsa"].astype(f32).reshape(1, C)  # (1, C) lane-major constant
    bsa = params["bsa"].astype(f32)                  # (1, 1)

    xr = x.reshape(N, C, HW)                         # free reshape; no pad, no copy
    itemsize = jnp.dtype(x.dtype).itemsize
    budget = _vmem_budget_bytes()
    vmem_kw = dict(vmem_limit_bytes=budget)
    inv_hw = 1.0 / float(HW)

    def const_spec(arr):
        return pl.BlockSpec(arr.shape, lambda *_: (0,) * arr.ndim)

    smem_spec = pl.BlockSpec(memory_space=pltpu.MemorySpace.SMEM)

    # ---- fused single-pass path ------------------------------------------
    # VMEM use ~= double-buffered in + out blocks plus an f32 compute temp.
    # TODO(synk): for N == 1 on v7x (2 TCs) the fused grid=(N,) leaves one core
    # idle; a tiled two-pass (or an N-split) would keep both cores busy.
    fused_bytes = (4 * itemsize + 8) * C * HW
    if fused_bytes <= budget and not force_two_pass:
        out = pl.pallas_call(
            functools.partial(_cbam_fused_kernel, inv_hw=inv_hw),
            out_shape=jax.ShapeDtypeStruct((N, C, HW), x.dtype),
            grid_spec=pltpu.PrefetchScalarGridSpec(
                num_scalar_prefetch=0,
                grid=(N,),
                in_specs=[
                    pl.BlockSpec((1, C, HW), lambda n: (n, 0, 0)),
                    const_spec(w1), const_spec(b1),
                    const_spec(w2), const_spec(b2),
                    const_spec(wsa_row),
                    smem_spec,
                ],
                out_specs=pl.BlockSpec((1, C, HW), lambda n: (n, 0, 0)),
            ),
            compiler_params=pltpu.CompilerParams(
                dimension_semantics=("parallel",), **vmem_kw),
            cost_estimate=pl.CostEstimate(
                flops=5 * N * C * HW,
                transcendentals=N * (HW + C),
                bytes_accessed=2 * N * C * HW * itemsize),
        )(xr, w1, b1, w2, b2, wsa_row, bsa)
        return out.reshape(N, C, H, W)

    # ---- two-pass streaming path -------------------------------------------
    # Pass-2 VMEM use ~= 2*(in) + 2*(out) blocks of (C, tile_hw).
    max_tile = budget // (4 * C * itemsize)
    tile_hw = max(128, min(2048, (max_tile // 128) * 128))
    tile_hw = min(tile_hw, _round_up(HW, 128))
    n_tiles = -(-HW // tile_hw)

    # Pass 1: per-image channel-attention weights ca_w (N, C, 1).
    caw = pl.pallas_call(
        functools.partial(_pool_mlp_kernel, hw=HW, tile_hw=tile_hw, inv_hw=inv_hw),
        out_shape=jax.ShapeDtypeStruct((N, C, 1), jnp.float32),
        grid_spec=pltpu.PrefetchScalarGridSpec(
            num_scalar_prefetch=0,
            grid=(N, n_tiles),
            in_specs=[
                pl.BlockSpec((1, C, tile_hw), lambda n, t: (n, 0, t)),
                const_spec(w1), const_spec(b1),
                const_spec(w2), const_spec(b2),
            ],
            out_specs=pl.BlockSpec((1, C, 1), lambda n, t: (n, 0, 0)),
            scratch_shapes=[pltpu.VMEM((C, 128), jnp.float32)],
        ),
        compiler_params=pltpu.CompilerParams(
            dimension_semantics=("parallel", "arbitrary"), **vmem_kw),
        cost_estimate=pl.CostEstimate(
            flops=N * C * HW,
            transcendentals=N * C,
            bytes_accessed=N * C * HW * itemsize),
    )(xr, w1, b1, w2, b2)

    # Pass 2: out = (ca_w * x) * sigmoid(wsa . (ca_w * x) + bsa).
    out = pl.pallas_call(
        _apply_kernel,
        out_shape=jax.ShapeDtypeStruct((N, C, HW), x.dtype),
        grid_spec=pltpu.PrefetchScalarGridSpec(
            num_scalar_prefetch=0,
            grid=(N, n_tiles),
            in_specs=[
                pl.BlockSpec((1, C, tile_hw), lambda n, t: (n, 0, t)),
                pl.BlockSpec((1, C, 1), lambda n, t: (n, 0, 0)),
                const_spec(wsa_row),
                smem_spec,
            ],
            out_specs=pl.BlockSpec((1, C, tile_hw), lambda n, t: (n, 0, t)),
        ),
        compiler_params=pltpu.CompilerParams(
            dimension_semantics=("parallel", "parallel"), **vmem_kw),
        cost_estimate=pl.CostEstimate(
            flops=5 * N * C * HW,
            transcendentals=N * HW,
            bytes_accessed=2 * N * C * HW * itemsize),
    )(xr, caw, wsa_row, bsa)

    return out.reshape(N, C, H, W)


def cbam_reference(x, p):
    """Plain-JAX reference mirroring the PyTorch forward (NCHW)."""
    N, C, H, W = x.shape
    pooled = x.mean(axis=(2, 3))                                     # (N, C)
    h = jnp.maximum(pooled @ p["w1"] + p["b1"], 0.0)                 # (N, hidden)
    ca_w = jax.nn.sigmoid(h @ p["w2"].T + p["b2"].reshape(1, C))     # (N, C)
    ca = ca_w[:, :, None, None] * x                                  # (N, C, H, W)
    sa_logit = jnp.einsum("nchw,c->nhw", ca, p["wsa"][:, 0]) + p["bsa"][0, 0]
    sa = jax.nn.sigmoid(sa_logit)                                    # (N, H, W)
    return ca * sa[:, None, :, :]


def init_params(key, in_planes):
    hidden = in_planes // 16
    k1, k2, k3, k4, k5, k6 = jax.random.split(key, 6)
    scale = 0.1
    return {
        # conv1 (hidden, C, 1, 1) -> stored transposed as (C, hidden)
        "w1": scale * jax.random.normal(k1, (in_planes, hidden), jnp.float32),
        "b1": scale * jax.random.normal(k2, (1, hidden), jnp.float32),
        # conv2 (C, hidden, 1, 1) -> stored as (C, hidden)
        "w2": scale * jax.random.normal(k3, (in_planes, hidden), jnp.float32),
        "b2": scale * jax.random.normal(k4, (in_planes, 1), jnp.float32),
        # spatial-attn conv (1, C, 1, 1) -> stored as (C, 1)
        "wsa": scale * jax.random.normal(k5, (in_planes, 1), jnp.float32),
        "bsa": scale * jax.random.normal(k6, (1, 1), jnp.float32),
    }


if __name__ == "__main__":
    key = jax.random.PRNGKey(0)
    kx1, kx2, kp = jax.random.split(key, 3)

    # in_planes must be >= 16 for the C -> C//16 bottleneck to be non-degenerate.
    C = 32
    params = init_params(kp, C)

    # Case 1: image fits in VMEM -> fused single-pass kernel (x read once).
    x1 = jax.random.normal(kx1, (2, C, 16, 16), jnp.float32)
    out1 = jax.block_until_ready(cbam_forward(x1, params))
    np.testing.assert_allclose(np.asarray(out1),
                               np.asarray(cbam_reference(x1, params)),
                               rtol=2e-4, atol=2e-5)

    # Case 2: force the two-pass streaming path with a spatial extent that is
    # not tile-aligned (HW = 2304, tile = 2048) to exercise the masked pooling
    # accumulation and the clipped ragged output tile.
    x2 = jax.random.normal(kx2, (2, C, 48, 48), jnp.float32)
    out2 = jax.block_until_ready(cbam_forward(x2, params, force_two_pass=True))
    np.testing.assert_allclose(np.asarray(out2),
                               np.asarray(cbam_reference(x2, params)),
                               rtol=2e-4, atol=2e-5)

    print("KERNEL_OK")
</pallas_src>

<mosaic_0001>
module attributes {stable_mosaic.version = 11 : i64} {
  func.func @_cbam_fused_kernel(%arg0: i32, %arg1: memref<1x32x256xf32, #tpu.memory_space<vmem>>, %arg2: memref<32x2xf32, #tpu.memory_space<vmem>>, %arg3: memref<1x2xf32, #tpu.memory_space<vmem>>, %arg4: memref<32x2xf32, #tpu.memory_space<vmem>>, %arg5: memref<32x1xf32, #tpu.memory_space<vmem>>, %arg6: memref<1x32xf32, #tpu.memory_space<vmem>>, %arg7: memref<1x1xf32, #tpu.memory_space<smem>>, %arg8: memref<1x32x256xf32, #tpu.memory_space<vmem>>) attributes {dimension_semantics = [#tpu.dimension_semantics<parallel>], iteration_bounds = array<i64: 2>, scalar_prefetch = 0 : i64, scratch_operands = 0 : i64, tpu.core_type = #tpu.core_type<tc>, window_params = [{transform_indices = @transform_0, window_bounds = array<i64: 1, 32, 256>}, {pipeline_mode = #tpu.pipeline_mode<synchronous>, transform_indices = @transform_1, window_bounds = array<i64: 32, 2>}, {pipeline_mode = #tpu.pipeline_mode<synchronous>, transform_indices = @transform_2, window_bounds = array<i64: 1, 2>}, {pipeline_mode = #tpu.pipeline_mode<synchronous>, transform_indices = @transform_3, window_bounds = array<i64: 32, 2>}, {pipeline_mode = #tpu.pipeline_mode<synchronous>, transform_indices = @transform_4, window_bounds = array<i64: 32, 1>}, {pipeline_mode = #tpu.pipeline_mode<synchronous>, transform_indices = @transform_5, window_bounds = array<i64: 1, 32>}, {transform_indices = @transform_6, window_bounds = array<i64: 1, 1>}, {transform_indices = @transform_7, window_bounds = array<i64: 1, 32, 256>}]} {
    %c0 = arith.constant 0 : index
    %c0_0 = arith.constant 0 : index
    %c0_1 = arith.constant 0 : index
    %0 = vector.load %arg1[%c0, %c0_0, %c0_1] : memref<1x32x256xf32, #tpu.memory_space<vmem>>, vector<1x32x256xf32>
    %1 = vector.shape_cast %0 : vector<1x32x256xf32> to vector<32x256xf32>
    %cst = arith.constant dense<0.000000e+00> : vector<32xf32>
    %2 = vector.multi_reduction <add>, %1, %cst [1] : vector<32x256xf32> to vector<32xf32>
    %3 = vector.shape_cast %2 : vector<32xf32> to vector<32x1xf32>
    %cst_2 = arith.constant 3.906250e-03 : f32
    %4 = vector.broadcast %cst_2 : f32 to vector<32x1xf32>
    %5 = arith.mulf %3, %4 : vector<32x1xf32>
    %c0_3 = arith.constant 0 : index
    %c0_4 = arith.constant 0 : index
    %6 = vector.load %arg2[%c0_3, %c0_4] : memref<32x2xf32, #tpu.memory_space<vmem>>, vector<32x2xf32>
    %7 = vector.broadcast %5 : vector<32x1xf32> to vector<32x2xf32>
    %8 = arith.mulf %7, %6 : vector<32x2xf32>
    %cst_5 = arith.constant dense<0.000000e+00> : vector<2xf32>
    %9 = vector.multi_reduction <add>, %8, %cst_5 [0] : vector<32x2xf32> to vector<2xf32>
    %10 = vector.shape_cast %9 : vector<2xf32> to vector<1x2xf32>
    %c0_6 = arith.constant 0 : index
    %c0_7 = arith.constant 0 : index
    %11 = vector.load %arg3[%c0_6, %c0_7] : memref<1x2xf32, #tpu.memory_space<vmem>>, vector<1x2xf32>
    %12 = arith.addf %10, %11 : vector<1x2xf32>
    %cst_8 = arith.constant 0.000000e+00 : f32
    %13 = vector.broadcast %cst_8 : f32 to vector<1x2xf32>
    %14 = arith.maximumf %12, %13 : vector<1x2xf32>
    %c0_9 = arith.constant 0 : index
    %c0_10 = arith.constant 0 : index
    %15 = vector.load %arg4[%c0_9, %c0_10] : memref<32x2xf32, #tpu.memory_space<vmem>>, vector<32x2xf32>
    %16 = vector.broadcast %14 : vector<1x2xf32> to vector<32x2xf32>
    %17 = arith.mulf %15, %16 : vector<32x2xf32>
    %cst_11 = arith.constant dense<0.000000e+00> : vector<32xf32>
    %18 = vector.multi_reduction <add>, %17, %cst_11 [1] : vector<32x2xf32> to vector<32xf32>
    %19 = vector.shape_cast %18 : vector<32xf32> to vector<32x1xf32>
    %c0_12 = arith.constant 0 : index
    %c0_13 = arith.constant 0 : index
    %20 = vector.load %arg5[%c0_12, %c0_13] : memref<32x1xf32, #tpu.memory_space<vmem>>, vector<32x1xf32>
    %21 = arith.addf %19, %20 : vector<32x1xf32>
    %22 = arith.negf %21 : vector<32x1xf32>
    %23 = math.exp %22 : vector<32x1xf32>
    %cst_14 = arith.constant 1.000000e+00 : f32
    %24 = vector.broadcast %cst_14 : f32 to vector<32x1xf32>
    %25 = arith.addf %24, %23 : vector<32x1xf32>
    %26 = arith.divf %24, %25 : vector<32x1xf32>
    %27 = vector.broadcast %26 : vector<32x1xf32> to vector<32x256xf32>
    %28 = arith.mulf %27, %1 : vector<32x256xf32>
    %c0_15 = arith.constant 0 : index
    %c0_16 = arith.constant 0 : index
    %29 = vector.load %arg6[%c0_15, %c0_16] : memref<1x32xf32, #tpu.memory_space<vmem>>, vector<1x32xf32>
    %cst_17 = arith.constant dense<0.000000e+00> : vector<1x256xf32>
    %30 = tpu.matmul %29, %28, %cst_17 {dimension_numbers = #tpu.dot_dimension_numbers<[1], [0], [0], [1], [0, 0, 1, 1], [], []>} : vector<1x32xf32>, vector<32x256xf32>, vector<1x256xf32> -> vector<1x256xf32>
    %c0_18 = arith.constant 0 : index
    %c0_19 = arith.constant 0 : index
    %31 = memref.load %arg7[%c0_18, %c0_19] : memref<1x1xf32, #tpu.memory_space<smem>>
    %32 = vector.broadcast %31 : f32 to vector<1x256xf32>
    %33 = arith.addf %30, %32 : vector<1x256xf32>
    %34 = arith.negf %33 : vector<1x256xf32>
    %35 = math.exp %34 : vector<1x256xf32>
    %cst_20 = arith.constant 1.000000e+00 : f32
    %36 = vector.broadcast %cst_20 : f32 to vector<1x256xf32>
    %37 = arith.addf %36, %35 : vector<1x256xf32>
    %38 = arith.divf %36, %37 : vector<1x256xf32>
    %39 = vector.broadcast %38 : vector<1x256xf32> to vector<32x256xf32>
    %40 = arith.mulf %28, %39 : vector<32x256xf32>
    %c0_21 = arith.constant 0 : index
    %c0_22 = arith.constant 0 : index
    %c0_23 = arith.constant 0 : index
    %41 = vector.load %arg8[%c0_21, %c0_22, %c0_23] : memref<1x32x256xf32, #tpu.memory_space<vmem>>, vector<1x32x256xf32>
    %42 = vector.shape_cast %41 : vector<1x32x256xf32> to vector<32x256xf32>
    %43 = vector.shape_cast %40 : vector<32x256xf32> to vector<1x32x256xf32>
    tpu.vector_store %arg8[%c0_21, %c0_22, %c0_23], %43 {strides = array<i32>} : memref<1x32x256xf32, #tpu.memory_space<vmem>>, vector<1x32x256xf32>,
    return
  }
  func.func @transform_0(%arg0: i32) -> (i32, i32, i32) {
    %c0_i32 = arith.constant 0 : i32
    %c0_i32_0 = arith.constant 0 : i32
    %c0_i32_1 = arith.constant 0 : i32
    return %arg0, %c0_i32, %c0_i32_0 : i32, i32, i32
  }
  func.func @transform_1(%arg0: i32) -> (i32, i32) {
    %c0_i32 = arith.constant 0 : i32
    %c0_i32_0 = arith.constant 0 : i32
    %c0_i32_1 = arith.constant 0 : i32
    return %c0_i32, %c0_i32_0 : i32, i32
  }
  func.func @transform_2(%arg0: i32) -> (i32, i32) {
    %c0_i32 = arith.constant 0 : i32
    %c0_i32_0 = arith.constant 0 : i32
    %c0_i32_1 = arith.constant 0 : i32
    return %c0_i32, %c0_i32_0 : i32, i32
  }
  func.func @transform_3(%arg0: i32) -> (i32, i32) {
    %c0_i32 = arith.constant 0 : i32
    %c0_i32_0 = arith.constant 0 : i32
    %c0_i32_1 = arith.constant 0 : i32
    return %c0_i32, %c0_i32_0 : i32, i32
  }
  func.func @transform_4(%arg0: i32) -> (i32, i32) {
    %c0_i32 = arith.constant 0 : i32
    %c0_i32_0 = arith.constant 0 : i32
    %c0_i32_1 = arith.constant 0 : i32
    return %c0_i32, %c0_i32_0 : i32, i32
  }
  func.func @transform_5(%arg0: i32) -> (i32, i32) {
    %c0_i32 = arith.constant 0 : i32
    %c0_i32_0 = arith.constant 0 : i32
    %c0_i32_1 = arith.constant 0 : i32
    return %c0_i32, %c0_i32_0 : i32, i32
  }
  func.func @transform_6(%arg0: i32) -> (i32, i32) {
    %c0_i32 = arith.constant 0 : i32
    %c0_i32_0 = arith.constant 0 : i32
    %c0_i32_1 = arith.constant 0 : i32
    return %c0_i32, %c0_i32_0 : i32, i32
  }
  func.func @transform_7(%arg0: i32) -> (i32, i32, i32) {
    %c0_i32 = arith.constant 0 : i32
    %c0_i32_0 = arith.constant 0 : i32
    %c0_i32_1 = arith.constant 0 : i32
    return %arg0, %c0_i32, %c0_i32_0 : i32, i32, i32
  }
}

</mosaic_0001>

<bundles_post_ra>
// kernel: tpu_custom_call.1
= control target key start
LH: loop header
LB: loop body
LE: loop exit
PB: predicated region body
PF: predicated region fallthrough
CT: control target
= control target key end

     0   :  { %s1123_s0 = inlined_call_operand.hbm [shape: f32[2,32,256], index: 0, kind: input, shape index: {}]   ;;  %s1124_s1 = inlined_call_operand.vmem [shape: f32[32,2], index: 1, kind: input, shape index: {}]   ;;  %s1125_s2 = inlined_call_operand.vmem [shape: f32[1,2], index: 2, kind: input, shape index: {}]   ;;  %s1126_s3 = inlined_call_operand.vmem [shape: f32[32,2], index: 3, kind: input, shape index: {}]   ;;  %s1127_s4 = inlined_call_operand.vmem [shape: f32[32,1], index: 4, kind: input, shape index: {}]   ;;  %s1128_s5 = inlined_call_operand.vmem [shape: f32[1,32], index: 5, kind: input, shape index: {}]   ;;  %s1129_s6 = inlined_call_operand.<no memory space> [shape: f32[1,1], index: 6, kind: input, shape index: {}]   ;;  %s1130_s7 = inlined_call_operand.hbm [shape: f32[2,32,256], index: 7, kind: output, shape index: {}]  }
   0x1   :  { %12 = sst [smem:[#allocation2]] %s1129_s6 }
   0x2   :  { %13 = vsyncpa [#allocation4], 0 }
   0x3   :  { %15 = vsyncpa [#allocation4 + $0x1], 0 }
   0x4   :  { %16 = vsyncpa [#allocation5], 0 }
   0x5   :  { %18 = vsyncpa [#allocation5 + $0x1], 0  ;;  %s878_s26 = smov 0   ;;  %s880_s27 = smov 0  }
   0x6   :  { %s882_s28 = smov 0   ;;  %s884_s29 = smov 0  }
   0x7 LB: > { %s899_s6 = sadd.s32 4294967295, %s825_s29   ;;  %s632_s30 = sadd.s32 4294967294, %s825_s29   ;;  %s825_s29 = sphi %s884_s29, %s1145_s29   ;;  %s821_s28 = sphi %s882_s28, %s1144_s28   ;;  %s817_s27 = sphi %s880_s27, %s1143_s27   ;;  %s813_s26 = sphi %s878_s26, %s1142_s26  }
   0x8   : > { %s903_s8 = sadd.s32 1, %s825_s29   ;;  %s31_s9 = sadd.s32 1, %s821_s28 }
   0x9   : > { %s28_s10 = ssub.s32 %s825_s29, %s903_s8  ;;  %p38_p0 = scmp.ne.s32.totalorder %s821_s28, %s817_s27 }
   0xa   : > { %p29_p1 = scmp.eq.s32.totalorder %s28_s10, 0  ;;  %p39_p2 = scmp.eq.s32.totalorder %s825_s29, 0 }
   0xb   : > { %p44_p3 = scmp.ne.s32.totalorder %s817_s27, %s813_s26  ;;  %p45_p4 = scmp.eq.s32.totalorder %s899_s6, 0 }
   0xc   : > { %s915_s11 = scalar_select %p29_p1, %s821_s28, %s31_s9  }
   0xd   : > { %p917_p5 = por %p39_p2, %p38_p0  ;;  %p921_p6 = por %p45_p4, %p44_p3 }
   0xe   : > { %p194_p7 = scmp.eq.s32.totalorder %s899_s6, 1  ;;  %p200_p8 = scmp.eq.s32.totalorder %s632_s30, 1 }
   0xf   : > { %s1134_s13 = scalar_select %p921_p6, 1, 0 }
  0x10   : > { %p667_p10 = scmp.lt.s32.totalorder %s825_s29, 2  ;;  %p928_p11 = por %p194_p7, %p38_p0 }
  0x11   : > { %p932_p12 = por %p200_p8, %p44_p3  ;;  %s238_s16 = sand.u32 1, %s821_s28  }
  0x12   : > { %s1135_s14 = scalar_select %p928_p11, 1, 0 }
  0x13   : > { %s1136_s15 = scalar_select %p932_p12, 1, 0 }
  0x14   : > { %s653_s17 = sshll.u32 %s825_s29, 10  ;;  %s635_s18 = sshll.u32 %s238_s16, 6 }
  0x15   : > { %s941_s21 = scalar_lea.hbm %s1123_s0, %s653_s17  ;;  %s242_s22 = scalar_lea.vmem [#allocation3], %s635_s18 }
  0x16   : > { %s249_s23 = sshll.u32 %s242_s22, 4  ;;  %p945_p13 = pnand %p667_p10, %p917_p5  ;;  %s949_s23 = int_to_ptr.vmem [resolvable:$true] %s249_s23 }
  0x17   : > { %s951_s25 = scalar_lea.sflag [#allocation4], %s238_s16  ;;  %s733_s30 = scalar_lea.hbm %s941_s21, 1024 }
  0x18   : > { %p734_p0 = scmp.ne.s32.totalorder %s941_s21, %s733_s30  ;;  %p735_p1 = pneg %p945_p13 }
  0x19   : > { %s738_s17 = scalar_lea.hbm %s1123_s0, 2048  ;;  %p739_p4 = scmp.lt.s32.totalorder %s941_s21, %s1123_s0 }
  0x1a   : > { %p736_p2 = pnand %p735_p1, %p734_p0  ;;  %p740_p5 = scmp.lt.s32.totalorder %s738_s17, %s733_s30 }
  0x1c   : > { %p737_p3 = pneg %p736_p2  ;;  %p741_p7 = por %p740_p5, %p739_p4 }
  0x1e   : > { %p742_p8 = pnand %p741_p7, %p737_p3 }
  0x20   : > { %745 = shalt.err (!%p742_p8)
}
  0x21   : > { %s746_s16 = scalar_lea.vmem %s949_s23, 1024  ;;  %s827_s19 = smov [#allocation3]  }
  0x22   : > { %p747_p10 = scmp.ne.s32.totalorder %s949_s23, %s746_s16  ;;  %s751_s20 = sshll.u32 %s827_s19, 4  ;;  %s752_s20 = int_to_ptr.vmem [resolvable:$false] %s751_s20 }
  0x23   : > { %s753_s22 = scalar_lea.vmem %s752_s20, 2048  ;;  %p754_p2 = scmp.lt.s32.totalorder %s949_s23, %s752_s20 }
  0x24   : > { %p749_p9 = pnand %p747_p10, %p735_p1  ;;  %p755_p12 = scmp.lt.s32.totalorder %s753_s22, %s746_s16 }
  0x26   : > { %p750_p0 = pneg %p749_p9  ;;  %p756_p11 = por %p755_p12, %p754_p2 }
  0x28   : > { %p757_p6 = pnand %p756_p11, %p750_p0 }
  0x2a   : > { %760 = shalt.err (!%p757_p6)
}
  0x2b   : > { %s828_s30 = smov 256   ;;  %s829_s9 = smov 16  }
  0x2c   : > { %662 = dma.hbm_to_vmem [thread:$0]  (!%p945_p13), %s941_s21, 1024, %s949_s23, %s951_s25, %s828_s30, %s828_s30, %s829_s9  }
  0x2d   : > { %p638_p9 = scmp.ge.s32.totalorder %s825_s29, 1  ;;  %p257_p1 = scmp.lt.s32.totalorder %s825_s29, 3 }
  0x2f   : > { %p258_p3 = pnand %p638_p9, %p257_p1 }
  0x30   : > { %s975_s10 = sand.u32 (!%p258_p3), 1, %s817_s27   ;;  %p1138_p6 = scmp.ne.s32.totalorder (!%p258_p3), %s1134_s13, 0 }
  0x31   : > { %261 = sbr.rel (%p258_p3) target bundleno = 790 (0x316), region = 48  ;;  %s639_s17 = sshll.u32 (!%p258_p3), %s975_s10, 6 }
  0x32   : > { %s264_s12 = scalar_lea.sflag (!%p258_p3), [#allocation4], %s975_s10  ;;  %s267_s18 = scalar_lea.vmem (!%p258_p3), [#allocation3], %s639_s17 }
  0x36   : > { %804 = dma.done.wait (%p1138_p6), %s264_s12, 1024  }
  0x37   : > { %806 = vsyncadd (%p1138_p6), %s264_s12, 4294966272  ;;  %v985_v0 = vld [vmem:[%s267_s18] sm:$0xff]  ;;  %v987_v1 = vld [vmem:[%s267_s18 + $0x8] sm:$0xff]  ;;  %vm330_vm0 = vcmask 15360   ;;  %v351_v38 = vlaneseq  ;;  %v830_v60 = vmov 0   ;;  %vm434_vm1 = vcmask 261120  }
  0x38   : > { %v989_v2 = vld [vmem:[%s267_s18 + $0x20] sm:$0xff]  ;;  %v306_v3 = vadd.f32 %v987_v1, %v985_v0  ;;  %v993_v4 = vld [vmem:[%s267_s18 + $0x28] sm:$0xff]  ;;  %v995_v5 = vld [vmem:[%s267_s18 + $0x10] sm:$0xff]  ;;  %708 = vset.pattern.permute.xlu1 %v830_v60  ;;  %707 = vset.pattern.permute.xlu0 %v830_v60  ;;  %s432_s23 = sld [smem:[#allocation2]]  ;;  %s654_s24 = sshll.u32 %s899_s6, 10 }
  0x39   : > { %v997_v6 = vld [vmem:[%s267_s18 + $0x18] sm:$0xff]  ;;  %v312_v7 = vadd.f32 %v993_v4, %v989_v2  ;;  %v1001_v8 = vld [vmem:[%s267_s18 + $0x30] sm:$0xff]  ;;  %v322_v15 = vld [vmem:[%s1124_s1] sm:$0xff]  ;;  %v352_v41 = vshrl.u32 %v351_v38, 7  ;;  %s297_s25 = scalar_lea.vmem [#allocation6], %s639_s17  ;;  %s1078_s22 = scalar_lea.hbm %s1130_s7, %s654_s24 }
  0x3a   : > { %v1003_v9 = vld [vmem:[%s267_s18 + $0x38] sm:$0xff]  ;;  %307 = vadd.xlane.f32.xlu0 %v306_v3  ;;  %v309_v10 = vadd.f32 %v997_v6, %v995_v5  ;;  %v324_v17 = vld [vmem:[%s1124_s1 + $0x10] sm:$0xff]  ;;  %v323_v18 = vld [vmem:[%s1124_s1 + $0x8] sm:$0xff]  ;;  %s559_s16 = sshll.u32 %s297_s25, 4  ;;  %s546_s6 = scalar_lea.sflag [#allocation5], %s975_s10  ;;  %s1080_s16 = int_to_ptr.vmem [resolvable:$true] %s559_s16 }
  0x3b   : > { %313 = vadd.xlane.f32.xlu1 %v312_v7  ;;  %v315_v11 = vadd.f32 %v1003_v9, %v1001_v8  ;;  %v325_v22 = vld [vmem:[%s1124_s1 + $0x18] sm:$0xff]  ;;  %v344_v42 = vld [vmem:[%s1125_s2] sm:$0x1]  ;;  %v1028_v45 = vsub.s32 0, %v352_v41  ;;  %v349_v48 = vld [vmem:[%s1126_s3 + $0x10] sm:$0xff]  ;;  %s761_s17 = scalar_lea.vmem %s1080_s16, 1024 }
  0x3c   : > { %v350_v47 = vld [vmem:[%s1126_s3 + $0x18] sm:$0xff]  ;;  %v348_v50 = vld [vmem:[%s1126_s3 + $0x8] sm:$0xff]  ;;  %v347_v51 = vld [vmem:[%s1126_s3] sm:$0xff]  ;;  %p762_p11 = scmp.ne.s32.totalorder %s1080_s16, %s761_s17  ;;  %p1139_p12 = scmp.ne.s32.totalorder %s1135_s14, 0 }
  0x3d   : > { %v374_v61 = vld [vmem:[%s1127_s4 + $0x18] sm:$0xff]  ;;  %v373_v62 = vld [vmem:[%s1127_s4 + $0x10] sm:$0xff]  ;;  %s832_s30 = smov [#allocation6]  }
  0x3e   : > { %310 = vadd.xlane.f32.xlu0 %v309_v10  ;;  %p763_p13 = pnand %p762_p11, %p1139_p12  ;;  %s765_s9 = sshll.u32 %s832_s30, 4  ;;  %s766_s9 = int_to_ptr.vmem [resolvable:$false] %s765_s9 }
  0x3f   : > { %316 = vadd.xlane.f32.xlu1 %v315_v11  ;;  %v372_v11 = vld [vmem:[%s1127_s4 + $0x8] sm:$0xff]  ;;  %s767_s12 = scalar_lea.vmem %s766_s9, 2048  ;;  %p768_p5 = scmp.lt.s32.totalorder %s1080_s16, %s766_s9 }
  0x40   : > { %p764_p4 = pneg %p763_p13  ;;  %p769_p7 = scmp.lt.s32.totalorder %s767_s12, %s761_s17 }
  0x42   : > { %p770_p8 = por %p769_p7, %p768_p5 }
  0x44   : > { %p771_p10 = pnand %p770_p8, %p764_p4 }
  0xc3   : > { %v308_v12 = vpop.xlane.xlu0 %307 }
  0xc4   : > { %v318_v13 = vmul.f32 0.00390625, %v308_v12  ;;  %v314_v14 = vpop.xlane.xlu1 %313  ;;  %v371_v12 = vld [vmem:[%s1127_s4] sm:$0xff] }
  0xc5   : > { %v320_v16 = vmul.f32 0.00390625, %v314_v14 }
  0xc6   : > { %v326_v20 = vmul.f32 %v322_v15, %v318_v13 }
  0xc7   : > { %v311_v19 = vpop.xlane.xlu0 %310  ;;  %v328_v25 = vmul.f32 %v324_v17, %v320_v16 }
  0xc8   : > { %v319_v21 = vmul.f32 0.00390625, %v311_v19  ;;  %v317_v23 = vpop.xlane.xlu1 %316  ;;  %v331_v28 = vsel %vm330_vm0, %v326_v20, 0.0 }
  0xc9   : > { %v321_v24 = vmul.f32 0.00390625, %v317_v23  ;;  %v334_v31 = vsel %vm330_vm0, %v328_v25, 0.0 }
  0xca   : > { %v327_v26 = vmul.f32 %v323_v18, %v319_v21 }
  0xcb   : > { %v329_v27 = vmul.f32 %v325_v22, %v321_v24 }
  0xcc   : > { %v332_v29 = vsel %vm330_vm0, %v327_v26, 0.0 }
  0xcd   : > { %v333_v30 = vadd.f32 %v332_v29, %v331_v28  ;;  %v336_v32 = vsel %vm330_vm0, %v329_v27, 0.0 }
  0xcf   : > { %v335_v33 = vadd.f32 %v334_v31, %v333_v30 }
  0xd1   : > { %v337_v34 = vadd.f32 %v336_v32, %v335_v33  ;;  %v831_v33 = vmov 0.0  }
  0xd2   : > { %502 = vmatprep.mubr.f32.mxu0 %v831_v33 }
  0xd3   : > { %v338_v35 = vrot.slane %v337_v34, 4 }
  0xd5   : > { %v339_v36 = vadd.f32 %v338_v35, %v337_v34 }
  0xd7   : > { %v340_v37 = vrot.slane %v339_v36, 2 }
  0xd9   : > { %v341_v39 = vadd.f32 %v340_v37, %v339_v36 }
  0xdb   : > { %v342_v40 = vrot.slane %v341_v39, 1 }
  0xdd   : > { %v343_v43 = vadd.f32 %v342_v40, %v341_v39 }
  0xdf   : > { %v345_v44 = vadd.f32 %v344_v42, %v343_v43 }
  0xe1   : > { %v346_v46 = vmax.f32 %v345_v44, 0.0 }
  0xe3   : > { %v354_v49 = vrot.slane %v346_v46, %v1028_v45 }
  0xe5   : > { %v358_v52 = vmul.f32 %v354_v49, %v350_v47  ;;  %v357_v53 = vmul.f32 %v354_v49, %v349_v48  ;;  %v356_v56 = vmul.f32 %v354_v49, %v348_v50  ;;  %v355_v57 = vmul.f32 %v354_v49, %v347_v51 }
  0xe7   : > { %v368_v54 = vsel %vm330_vm0, %v358_v52, 0.0  ;;  %v365_v55 = vsel %vm330_vm0, %v357_v53, 0.0  ;;  %v362_v58 = vsel %vm330_vm0, %v356_v56, 0.0  ;;  %v359_v59 = vsel %vm330_vm0, %v355_v57, 0.0 }
  0xe8   : > { %369 = vadd.xlane.f32.xlu0 %v368_v54  ;;  %366 = vadd.xlane.f32.xlu1 %v365_v55 }
  0xec   : > { %363 = vadd.xlane.f32.xlu0 %v362_v58  ;;  %360 = vadd.xlane.f32.xlu1 %v359_v59 }
 0x171   : > { %v370_v63 = vpop.xlane.xlu0 %369  ;;  %v367_v3 = vpop.xlane.xlu1 %366 }
 0x172   : > { %v378_v7 = vadd.f32 %v374_v61, %v370_v63  ;;  %v377_v10 = vadd.f32 %v373_v62, %v367_v3 }
 0x174   : > { %v644_v13 = vmul.f32 -1.442695, %v378_v7  ;;  %v643_v14 = vmul.f32 -1.442695, %v377_v10 }
 0x175   : > { %v364_v15 = vpop.xlane.xlu0 %363  ;;  %v361_v16 = vpop.xlane.xlu1 %360 }
 0x176   : > { %709 = vpow2.f32 %v644_v13  ;;  %v376_v17 = vadd.f32 %v372_v11, %v364_v15  ;;  %v375_v18 = vadd.f32 %v371_v12, %v361_v16 }
 0x177   : > { %711 = vpow2.f32 %v643_v14 }
 0x178   : > { %v642_v19 = vmul.f32 -1.442695, %v376_v17  ;;  %v641_v20 = vmul.f32 -1.442695, %v375_v18 }
 0x17a   : > { %713 = vpow2.f32 %v642_v19 }
 0x17b   : > { %715 = vpow2.f32 %v641_v20 }
 0x183   : > { %v710_v21 = vpop.eup %709 }
 0x184   : > { %v712_v22 = vpop.eup %711  ;;  %v394_v23 = vadd.f32 1.0, %v710_v21 }
 0x185   : > { %v393_v24 = vadd.f32 1.0, %v712_v22 }
 0x186   : > { %717 = vrcp.f32 %v394_v23 }
 0x187   : > { %v714_v25 = vpop.eup %713  ;;  %719 = vrcp.f32 %v393_v24 }
 0x188   : > { %v716_v26 = vpop.eup %715  ;;  %v392_v27 = vadd.f32 1.0, %v714_v25 }
 0x189   : > { %v391_v28 = vadd.f32 1.0, %v716_v26 }
 0x18a   : > { %721 = vrcp.f32 %v392_v27 }
 0x18b   : > { %723 = vrcp.f32 %v391_v28 }
 0x193   : > { %v718_v29 = vpop.eup %717 }
 0x194   : > { %v720_v30 = vpop.eup %719  ;;  %420 = vperm.xlu0 %707, %v718_v29  }
 0x195   : > { %415 = vperm.xlu1 %708, %v720_v30  }
 0x197   : > { %v722_v31 = vpop.eup %721 }
 0x198   : > { %v724_v32 = vpop.eup %723 }
 0x199   : > { %410 = vperm.xlu1 %708, %v722_v31  }
 0x19d   : > { %405 = vperm.xlu1 %708, %v724_v32  }
 0x20f   : > { %v421_v34 = vpop.permute.xlu0 %420 }
 0x210   : > { %v429_v35 = vmul.f32 %v421_v34, %v1001_v8  ;;  %v430_v36 = vmul.f32 %v421_v34, %v1003_v9  ;;  %v416_v37 = vpop.permute.xlu1 %415 }
 0x211   : > { %v428_v38 = vmul.f32 %v416_v37, %v993_v4  ;;  %v427_v39 = vmul.f32 %v416_v37, %v989_v2  ;;  %v431_v4 = vld [vmem:[%s1128_s5] sm:$0x1]  ;;  %v433_v2 = vstv %s432_s23 }
 0x212   : > { %462 = vmatprep.subr.mxu0 %v430_v36 }
 0x213   : > { %463 = vmatpush1.msra.mxu0 %v429_v35 }
 0x214   : > { %v411_v40 = vpop.permute.xlu1 %410  ;;  %464 = vmatprep.subr.mxu0 %v428_v38 }
 0x215   : > { %v425_v41 = vmul.f32 %v411_v40, %v995_v5  ;;  %v426_v42 = vmul.f32 %v411_v40, %v997_v6  ;;  %465 = vmatpush1.msra.mxu0 %v427_v39 }
 0x217   : > { %466 = vmatprep.subr.mxu0 %v426_v42 }
 0x218   : > { %467 = vmatpush1.msra.mxu0 %v425_v41  ;;  %v406_v43 = vpop.permute.xlu1 %405 }
 0x219   : > { %v423_v8 = vmul.f32 %v406_v43, %v985_v0  ;;  %v424_v9 = vmul.f32 %v406_v43, %v987_v1 }
 0x21b   : > { %468 = vmatprep.subr.mxu0 %v424_v9 }
 0x21c   : > { %469 = vmatpush1.msra.mxu0 %v423_v8 }
 0x21d   : > { %645 = vmatmul.mubr.msk.f32.vlgmr.msra.gmra.mxu0 %vm434_vm1, %v431_v4 }
 0x2dd   : > { %v504_v5 = vpop.f32.mrf.mxu0 }
 0x2de   : > { %v505_v6 = vadd.f32 %v504_v5, %v433_v2 }
 0x2df   : > { %v506_v44 = vpop.f32.mrf.mxu0 }
 0x2e0   : > { %v646_v46 = vmul.f32 -1.442695, %v505_v6  ;;  %v507_v47 = vadd.f32 %v506_v44, %v433_v2 }
 0x2e2   : > { %725 = vpow2.f32 %v646_v46  ;;  %v647_v0 = vmul.f32 -1.442695, %v507_v47 }
 0x2e4   : > { %727 = vpow2.f32 %v647_v0 }
 0x2ef   : > { %v726_v1 = vpop.eup %725 }
 0x2f0   : > { %v515_v48 = vadd.f32 1.0, %v726_v1 }
 0x2f1   : > { %v728_v49 = vpop.eup %727 }
 0x2f2   : > { %729 = vrcp.f32 %v515_v48  ;;  %v516_v50 = vadd.f32 1.0, %v728_v49 }
 0x2f4   : > { %731 = vrcp.f32 %v516_v50 }
 0x2ff   : > { %v730_v51 = vpop.eup %729 }
 0x300   : > { %v524_v52 = vrot.slane %v730_v51, %v1028_v45 }
 0x301   : > { %v732_v53 = vpop.eup %731 }
 0x302   : > { %v529_v54 = vmul.f32 %v524_v52, %v423_v8  ;;  %v531_v55 = vmul.f32 %v524_v52, %v425_v41  ;;  %v533_v56 = vmul.f32 %v524_v52, %v427_v39  ;;  %v535_v57 = vmul.f32 %v524_v52, %v429_v35 }
 0x303   : > { %v528_v58 = vrot.slane %v732_v53, %v1028_v45 }
 0x304   : > { %537 = vst [vmem:[%s297_s25] sm:$0xff] %v529_v54  ;;  %539 = vst [vmem:[%s297_s25 + $0x10] sm:$0xff] %v531_v55 }
 0x305   : > { %541 = vst [vmem:[%s297_s25 + $0x20] sm:$0xff] %v533_v56  ;;  %543 = vst [vmem:[%s297_s25 + $0x30] sm:$0xff] %v535_v57  ;;  %v530_v59 = vmul.f32 %v528_v58, %v424_v9  ;;  %v532_v60 = vmul.f32 %v528_v58, %v426_v42  ;;  %v534_v61 = vmul.f32 %v528_v58, %v428_v38 }
 0x306   : > { %v536_v62 = vmul.f32 %v528_v58, %v430_v36 }
 0x307   : > { %538 = vst [vmem:[%s297_s25 + $0x8] sm:$0xff] %v530_v59  ;;  %540 = vst [vmem:[%s297_s25 + $0x18] sm:$0xff] %v532_v60 }
 0x308   : > { %542 = vst [vmem:[%s297_s25 + $0x28] sm:$0xff] %v534_v61  ;;  %544 = vst [vmem:[%s297_s25 + $0x38] sm:$0xff] %v536_v62 }
 0x309   : > { %774 = shalt.err (!%p771_p10)
}
 0x30a   : > { %s775_s18 = scalar_lea.hbm %s1078_s22, 1024  ;;  %s779_s23 = scalar_lea.hbm %s1130_s7, 2048 }
 0x30b   : > { %p776_p0 = scmp.ne.s32.totalorder %s1078_s22, %s775_s18  ;;  %p780_p1 = scmp.lt.s32.totalorder %s1078_s22, %s1130_s7 }
 0x30c   : > { %p781_p3 = scmp.lt.s32.totalorder %s779_s23, %s775_s18 }
 0x30d   : > { %p777_p2 = pnand %p776_p0, %p1139_p12 }
 0x30e   : > { %p782_p6 = por %p781_p3, %p780_p1 }
 0x30f   : > { %p778_p9 = pneg %p777_p2 }
 0x311   : > { %p783_p11 = pnand %p782_p6, %p778_p9 }
 0x313   : > { %786 = shalt.err (!%p783_p11)
}
 0x314   : > { %s833_s19 = smov 256   ;;  %s834_s20 = smov 16  }
 0x315   : > { %657 = dma.vmem_to_hbm [thread:$0]  (%p1139_p12), %s1080_s16, 1024, %s1078_s22, %s546_s6, %s833_s19, %s833_s19, %s834_s20  }
 0x316 PF: > { %s574_s17 = sand.u32 1, %s813_s26   ;;  %p1140_p13 = scmp.ne.s32.totalorder %s1136_s15, 0 }
 0x317   : > { %p1141_p4 = scmp.ge.s32.totalorder %s825_s29, 2  ;;  %s575_s30 = scalar_lea.sflag [#allocation5], %s574_s17 }
 0x319   : > { %p664_p5 = pnand %p1141_p4, %p1140_p13 }
 0x31b   : > { %p665_p7 = pneg %p664_p5 }
 0x31d   : > { %808 = dma.done.wait (%p665_p7), %s575_s30, 1024  }
 0x31e   : > { %810 = vsyncadd (%p665_p7), %s575_s30, 4294966272  ;;  %p21_p8 = scmp.ge.s32.totalorder %s903_s8, 4   ;;  %s1142_s26 = smov %s817_s27 }
 0x31f   : > { %s1143_s27 = smov %s821_s28  ;;  %s1144_s28 = smov %s915_s11 }
 0x320   : > { %s1145_s29 = smov %s903_s8  ;;  %23 = sbr.rel (!%p21_p8) target bundleno = 7 (0x7), region = 93 }
 0x325   :  { %580 = vsyncpa [#allocation4], 1 }
 0x326   :  { %582 = vsyncpa [#allocation4 + $0x1], 1 }
 0x327   :  { %583 = vsyncpa [#allocation5], 1 }
 0x328   :  { %585 = vsyncpa [#allocation5 + $0x1], 1 }

</bundles_post_ra>
